<compile_context>
chip_gen: v5e
topology: v5e:2x2
jax: 0.10.0
libtpu: 0.0.40
codegen_flags: <defaults>
</compile_context>

<pallas_src>
import jax
import jax.numpy as jnp
from jax.experimental import pallas as pl
from jax.experimental.pallas import tpu as pltpu


def _scale_fwd_kernel(s_ref, x_ref, out_ref):
    # s_ref: SMEM (1,) f32 holding exp(scale) (exp hoisted to the wrapper).
    # x_ref / out_ref: VMEM (tile_rows, lanes) tiles.
    s = s_ref[0].astype(out_ref.dtype)       # scalar broadcast, native dtype
    out_ref[...] = x_ref[...] * s


def _choose_tiling(rows, lanes, itemsize, target_tile_bytes):
    """Pick (tile_rows, grid_n) for a (rows, lanes) slab.

    Targets ~target_tile_bytes per tile but guarantees >=4 tiles (even count)
    when the input is large enough, so both v7x TensorCores get work and the
    double-buffered pipeline overlaps; tiny inputs stay a single full block.
    """
    if rows <= 8:
        return rows, 1                                      # full-dim block (legal)

    target_rows = max(8, (target_tile_bytes // (lanes * itemsize)) // 8 * 8)
    max_tiles = rows // 8                                   # can't go below 8-row tiles

    num_tiles = pl.cdiv(rows, target_rows)
    num_tiles = min(max(num_tiles, 4), max_tiles)           # >=4 tiles when possible
    if num_tiles > 1 and num_tiles % 2:                     # even count -> balanced
        num_tiles += 1 if num_tiles < max_tiles else -1     #   megacore split

    tile_rows = pl.cdiv(pl.cdiv(rows, num_tiles), 8) * 8
    tile_rows = min(tile_rows, rows)                        # == rows -> full-dim block
    grid_n = pl.cdiv(rows, tile_rows)
    return tile_rows, grid_n


def scale_layer_forward(x, scale, *, target_tile_bytes=4 << 20):
    """Pallas implementation of ScaleLayer.forward.

    Args:
      x: array of any shape (conv-style NCHW expected).
      scale: scalar (0-d) parameter.
    Returns:
      (x * exp(scale), scale) — matching the PyTorch module semantics.
    """
    orig_shape = x.shape
    n = x.size

    # scale.sum(-1) on a 0-d parameter is the parameter itself (keeps its dtype).
    logdet = jnp.asarray(scale)

    # Fallback path: ragged element counts would need a pad + slice HBM
    # roundtrip (~3x the kernel's own traffic), and integer inputs follow
    # PyTorch-style promotion to float — let XLA handle both directly.
    if n == 0 or n % 128 != 0 or not jnp.issubdtype(x.dtype, jnp.floating):
        s = jnp.exp(jnp.asarray(scale, jnp.float32))
        if jnp.issubdtype(x.dtype, jnp.floating):
            s = s.astype(x.dtype)
        return x * s, logdet

    # Widest lane-dense width that divides n exactly (no padding needed).
    lanes = 128
    for cand in (1024, 512, 256, 128):
        if n % cand == 0:
            lanes = cand
            break
    rows = n // lanes
    x2 = x.reshape(rows, lanes)

    itemsize = jnp.dtype(x.dtype).itemsize
    tile_rows, grid_n = _choose_tiling(rows, lanes, itemsize, target_tile_bytes)

    # Hoist the transcendental: one scalar exp in the wrapper, SMEM passthrough.
    s_arr = jnp.exp(jnp.asarray(scale, jnp.float32)).reshape(1)

    out2 = pl.pallas_call(
        _scale_fwd_kernel,
        out_shape=jax.ShapeDtypeStruct((rows, lanes), x.dtype),
        grid=(grid_n,),
        in_specs=[
            pl.BlockSpec(memory_space=pltpu.MemorySpace.SMEM),   # exp(scale) scalar
            pl.BlockSpec((tile_rows, lanes), lambda i: (i, 0)),  # x tile
        ],
        out_specs=pl.BlockSpec((tile_rows, lanes), lambda i: (i, 0)),
        compiler_params=pltpu.CompilerParams(
            dimension_semantics=("parallel",),   # shard tiles across v7x's 2 TCs
            vmem_limit_bytes=32 * 1024 * 1024,   # covers 4 MiB tiles on v5e too
        ),
    )(s_arr, x2)

    return out2.reshape(orig_shape), logdet


if __name__ == "__main__":
    key = jax.random.PRNGKey(0)

    # Deterministic parameter init, exactly like the module: scale = 0.0
    scale_param = jnp.float32(0.0)

    # Small NCHW input consistent with a conv-style flow model.
    x = jax.random.normal(key, (2, 4, 16, 16), dtype=jnp.float32)
    y, logdet = scale_layer_forward(x, scale_param)
    y = jax.block_until_ready(y)
    logdet = jax.block_until_ready(logdet)

    y_ref = x * jnp.exp(scale_param)
    assert y.shape == x.shape and y.dtype == x.dtype
    assert jnp.allclose(y, y_ref, atol=1e-6, rtol=1e-6)
    assert jnp.allclose(logdet, scale_param)

    # Non-multiple-of-128 element count: exercises the (pad-free) fallback path.
    x_odd = jax.random.normal(jax.random.PRNGKey(1), (3, 5, 37, 41), dtype=jnp.float32)
    sc_odd = jnp.float32(0.3)
    y_odd, ld_odd = scale_layer_forward(x_odd, sc_odd)
    y_odd = jax.block_until_ready(y_odd)
    assert jnp.allclose(y_odd, x_odd * jnp.exp(sc_odd), atol=1e-5, rtol=1e-5)
    assert jnp.allclose(ld_odd, sc_odd)

    # Larger input: exercises the multi-tile (>=4 tiles, pipelined) path.
    x_big = jax.random.normal(jax.random.PRNGKey(2), (8, 16, 64, 64), dtype=jnp.float32)
    sc_big = jnp.float32(-0.2)
    y_big, ld_big = scale_layer_forward(x_big, sc_big)
    y_big = jax.block_until_ready(y_big)
    assert jnp.allclose(y_big, x_big * jnp.exp(sc_big), atol=1e-5, rtol=1e-5)
    assert jnp.allclose(ld_big, sc_big)

    # bf16 input: native-dtype multiply path (no f32 upcast in the kernel).
    x_bf = jax.random.normal(jax.random.PRNGKey(3), (4, 8, 32, 32), dtype=jnp.bfloat16)
    sc_bf = jnp.float32(0.1)
    y_bf, ld_bf = scale_layer_forward(x_bf, sc_bf)
    y_bf = jax.block_until_ready(y_bf)
    y_bf_ref = x_bf * jnp.exp(sc_bf).astype(jnp.bfloat16)
    assert y_bf.dtype == jnp.bfloat16
    assert jnp.allclose(y_bf.astype(jnp.float32), y_bf_ref.astype(jnp.float32),
                        atol=2e-2, rtol=2e-2)
    assert jnp.allclose(ld_bf, sc_bf)

    print("KERNEL_OK")
</pallas_src>

<mosaic_0001>
module attributes {stable_mosaic.version = 11 : i64} {
  func.func @_scale_fwd_kernel(%arg0: i32, %arg1: memref<1xf32, #tpu.memory_space<smem>>, %arg2: memref<2x1024xf32, #tpu.memory_space<vmem>>, %arg3: memref<2x1024xf32, #tpu.memory_space<vmem>>) attributes {dimension_semantics = [#tpu.dimension_semantics<parallel>], iteration_bounds = array<i64: 1>, scalar_prefetch = 0 : i64, scratch_operands = 0 : i64, tpu.core_type = #tpu.core_type<tc>, window_params = [{transform_indices = @transform_0, window_bounds = array<i64: 1>}, {transform_indices = @transform_1, window_bounds = array<i64: 2, 1024>}, {transform_indices = @transform_2, window_bounds = array<i64: 2, 1024>}]} {
    %c0 = arith.constant 0 : index
    %0 = memref.load %arg1[%c0] : memref<1xf32, #tpu.memory_space<smem>>
    %c0_0 = arith.constant 0 : index
    %c0_1 = arith.constant 0 : index
    %1 = vector.load %arg2[%c0_0, %c0_1] : memref<2x1024xf32, #tpu.memory_space<vmem>>, vector<2x1024xf32>
    %2 = vector.broadcast %0 : f32 to vector<2x1024xf32>
    %3 = arith.mulf %1, %2 : vector<2x1024xf32>
    %c0_2 = arith.constant 0 : index
    %c0_3 = arith.constant 0 : index
    %4 = vector.load %arg3[%c0_2, %c0_3] : memref<2x1024xf32, #tpu.memory_space<vmem>>, vector<2x1024xf32>
    tpu.vector_store %arg3[%c0_2, %c0_3], %3 {strides = array<i32>} : memref<2x1024xf32, #tpu.memory_space<vmem>>, vector<2x1024xf32>,
    return
  }
  func.func @transform_0(%arg0: i32) -> i32 {
    %c0_i32 = arith.constant 0 : i32
    %c0_i32_0 = arith.constant 0 : i32
    return %c0_i32 : i32
  }
  func.func @transform_1(%arg0: i32) -> (i32, i32) {
    %c0_i32 = arith.constant 0 : i32
    %c0_i32_0 = arith.constant 0 : i32
    return %arg0, %c0_i32 : i32, i32
  }
  func.func @transform_2(%arg0: i32) -> (i32, i32) {
    %c0_i32 = arith.constant 0 : i32
    %c0_i32_0 = arith.constant 0 : i32
    return %arg0, %c0_i32 : i32, i32
  }
}

</mosaic_0001>

<bundles_post_ra>
// kernel: tpu_custom_call.1
= control target key start
LH: loop header
LB: loop body
LE: loop exit
PB: predicated region body
PF: predicated region fallthrough
CT: control target
= control target key end

     0   :  { %8 = vsyncpa [#allocation4], 0  ;;  %s132_s0 = inlined_call_operand.<no memory space> [shape: f32[1], index: 0, kind: input, shape index: {}]   ;;  %s133_s1 = inlined_call_operand.hbm [shape: f32[2,1024], index: 1, kind: input, shape index: {}]   ;;  %s134_s2 = inlined_call_operand.hbm [shape: f32[2,1024], index: 2, kind: output, shape index: {}]  }
   0x1   :  { %9 = vsyncpa [#allocation5], 0  ;;  %s17_s11 = sshll.u32 %s133_s1, 4  ;;  %s106_s12 = smov [#allocation3]   ;;  %s18_s11 = int_to_ptr.hbm [resolvable:$true] %s17_s11 }
   0x2   :  { %s19_s13 = sshll.u32 %s106_s12, 4  ;;  %s20_s13 = int_to_ptr.vmem [resolvable:$true] %s19_s13 }
   0x3   :  { %22 = dma.hbm_to_vmem [thread:$0]  %s18_s11, 256, %s20_s13, [#allocation4]  }
   0x4   :  { %102 = dma.done.wait [#allocation4], 256  }
   0x5   :  { %103 = vsyncadd [#allocation4], 4294967040  ;;  %v30_v0 = vstv %s132_s0  ;;  %s107_s16 = smov [#allocation6]   ;;  %s42_s20 = sshll.u32 %s134_s2, 4  ;;  %v28_v1 = vld [vmem:[#allocation3] sm:$0xff]  ;;  %v29_v2 = vld [vmem:[#allocation3 + $0x8] sm:$0xff]  ;;  %s43_s20 = int_to_ptr.hbm [resolvable:$true] %s42_s20 }
   0x6   :  { %s40_s17 = sshll.u32 %s107_s16, 4  ;;  %v31_v3 = vmul.f32 %v30_v0, %v28_v1  ;;  %v32_v4 = vmul.f32 %v30_v0, %v29_v2  ;;  %s41_s17 = int_to_ptr.vmem [resolvable:$true] %s40_s17 }
   0x8   :  { %33 = vst [vmem:[#allocation6] sm:$0xff] %v31_v3 }
   0x9   :  { %34 = vst [vmem:[#allocation6 + $0x8] sm:$0xff] %v32_v4 }
   0xa   :  { %45 = dma.vmem_to_hbm [thread:$0]  %s41_s17, 256, %s43_s20, [#allocation5]  }
   0xb   :  { %104 = dma.done.wait [#allocation5], 256  }
   0xc   :  { %105 = vsyncadd [#allocation5], 4294967040 }
   0xd   :  { %50 = vsyncpa [#allocation4], 1 }
   0xe   :  { %51 = vsyncpa [#allocation5], 1 }

</bundles_post_ra>
